<compile_context>
chip_gen: v7x
topology: tpu7x:2x2x1
jax: 0.10.0
libtpu: 0.0.40
codegen_flags: <defaults>
</compile_context>

<pallas_src>
import jax
import jax.numpy as jnp
from jax import lax
from jax.experimental import pallas as pl
from jax.experimental.pallas import tpu as pltpu


WS = 8               # swin window size (fixed by the module)
N = WS * WS          # tokens per window (64)
CHUNK = 8            # windows per inner-loop step (bounds live f32 temp to 128 KiB)


def _round_up(x, m):
    return (x + m - 1) // m * m


# ----------------------------- Pallas kernel ------------------------------

def _window_attn_kernel(x_ref, attn_ref):
    # x_ref:    (GB, N, Ch)  batched (window, head) features
    # attn_ref: (GB, N*N)    lane-dense self-similarity output
    gb, n, _ = x_ref.shape
    trips = gb // CHUNK

    def body(i, carry):
        s = pl.multiple_of(i * CHUNK, CHUNK)
        xc = x_ref[pl.ds(s, CHUNK), :, :]                       # (CHUNK, N, Ch)
        # Batched Gram matrix: contract the channel dim of both operands
        # (no explicit transpose / XLU traffic), f32 MXU accumulation.
        a = jnp.einsum("bnc,bmc->bnm", xc, xc,
                       preferred_element_type=jnp.float32)      # (CHUNK, N, N)
        # Per-chunk flatten keeps the relayout temp small while the
        # HBM-facing store stays unmasked, full-128-lane dense.
        attn_ref[pl.ds(s, CHUNK), :] = (
            a.reshape(CHUNK, n * n).astype(attn_ref.dtype))
        return carry

    lax.fori_loop(0, trips, body, None, unroll=min(trips, 8))


# ------------------------- tile / VMEM sizing ------------------------------

def _vmem_capacity_bytes():
    try:
        info = pltpu.get_tpu_info()
        for attr in ("vmem_capacity_bytes", "vmem_size_bytes", "vmem_bytes"):
            v = getattr(info, attr, None)
            if v:
                return int(v)
    except Exception:
        pass
    return 64 << 20   # conservative default: v7x per-TensorCore VMEM


def _choose_tile(G, Ch, in_itemsize):
    vmem_cap = _vmem_capacity_bytes()
    if vmem_cap >= (96 << 20):           # v5e / v6e: 128 MiB physical VMEM
        gb_max, vmem_limit = 512, 80 << 20
    else:                                 # v7x (or unknown): 64 MiB per TC
        gb_max, vmem_limit = 256, 48 << 20

    # Per (window, head) row of VMEM working set; minor dim is lane-padded
    # to 128, double-buffered input and output tiles.
    in_row = N * max(_round_up(Ch, 128), 128) * in_itemsize
    out_row = N * N * 4
    per_row = 2 * in_row + 2 * out_row
    gb_fit = max(8, int((vmem_limit * 3 // 4) // per_row) // 8 * 8)

    gb = min(gb_max, gb_fit, _round_up(G, 8))
    # Keep >= 2 grid steps when there is enough work so the "parallel" axis
    # shards across both v7x TensorCores instead of idling one.
    if G > 8:
        gb = min(gb, _round_up(pl.cdiv(G, 2), 8))
    return max(gb, CHUNK), vmem_limit


# ------------------------------ kernel wrapper ------------------------------

def _window_self_attn(xw, attn_dtype=jnp.float32):
    """xw: (G, N, Ch) -> attn (G, N, N) in attn_dtype."""
    G, n, Ch = xw.shape
    assert n == N
    gb, vmem_limit = _choose_tile(G, Ch, xw.dtype.itemsize)
    g_pad = _round_up(G, gb)
    if g_pad != G:
        xw = jnp.pad(xw, ((0, g_pad - G), (0, 0), (0, 0)))

    out_itemsize = jnp.dtype(attn_dtype).itemsize
    cost = pl.CostEstimate(
        flops=2 * g_pad * N * N * Ch,
        transcendentals=0,
        bytes_accessed=(g_pad * N * Ch * xw.dtype.itemsize
                        + g_pad * N * N * out_itemsize),
    )

    attn_flat = pl.pallas_call(
        _window_attn_kernel,
        out_shape=jax.ShapeDtypeStruct((g_pad, N * N), attn_dtype),
        grid_spec=pltpu.PrefetchScalarGridSpec(
            num_scalar_prefetch=0,
            grid=(g_pad // gb,),
            in_specs=[pl.BlockSpec((gb, N, Ch), lambda g: (g, 0, 0))],
            out_specs=pl.BlockSpec((gb, N * N), lambda g: (g, 0)),
        ),
        compiler_params=pltpu.CompilerParams(
            dimension_semantics=("parallel",),
            vmem_limit_bytes=vmem_limit,
        ),
        cost_estimate=cost,
    )(xw)

    return attn_flat[:G].reshape(G, N, N)


# ------------------------------ JAX module ----------------------------------

class NLSearch:
    """JAX/Pallas port of lib/nlnet/search/swin.py::NLSearch (forward only)."""

    def __init__(self, k=7, ps=7, nheads=1, compute_dtype=None,
                 attn_dtype=jnp.float32):
        self.k = k
        self.ps = ps
        self.ws = WS
        self.nheads = nheads
        # Optional bandwidth knobs: feed bf16 features / emit bf16 attn to
        # halve HBM traffic (MXU accumulation is f32 on all generations).
        # Defaults preserve the reference f32 numerics.
        self.compute_dtype = compute_dtype
        self.attn_dtype = attn_dtype

    def __call__(self, vid):
        B, T, C, H, W = vid.shape
        ws, nh = self.ws, self.nheads
        assert H % ws == 0 and W % ws == 0
        assert C % nh == 0
        Ch = C // nh
        BT, Hb, Wb = B * T, H // ws, W // ws
        B_ = BT * Hb * Wb

        # Single fused relayout replacing the previous three XLA passes
        # (NCHW->NHWC transpose, unfold, head-split transpose):
        #   (B,T,C,H,W) -> ((bt hb wb nh), ws*ws, Ch)
        # TODO(synk): this remaining relayout could be folded into the kernel's
        # index_map (grid over (bt, hb) with a (1, C, ws, W) block) to avoid
        # the last pre-kernel HBM round trip.
        x = vid.reshape(BT, nh, Ch, Hb, ws, Wb, ws)
        x = jnp.transpose(x, (0, 3, 5, 1, 4, 6, 2))      # (BT,Hb,Wb,nh,ws,ws,Ch)
        xw = x.reshape(B_ * nh, N, Ch)
        if self.compute_dtype is not None:
            xw = xw.astype(self.compute_dtype)

        attn = _window_self_attn(xw, attn_dtype=self.attn_dtype)
        attn = attn.reshape(1, B_, nh, N, N)

        # Constant zeros matching the PyTorch module's second output; never
        # touched by the kernel (storing it would double kernel HBM writes).
        inds = jnp.zeros((1, B_, nh, N, N), jnp.int32)
        return attn, inds


# ------------------------------ demo / check --------------------------------

def _unfold_ref(x, ws):
    B, H, W, C = x.shape
    x = x.reshape(B, H // ws, ws, W // ws, ws, C)
    x = jnp.transpose(x, (0, 1, 3, 2, 4, 5))
    return x.reshape(-1, ws * ws, C)


def _reference(vid, nheads, ws=WS):
    B, T, C, H, W = vid.shape
    x = jnp.transpose(vid.reshape(B * T, C, H, W), (0, 2, 3, 1))
    w = _unfold_ref(x, ws)
    B_, n, _ = w.shape
    Ch = C // nheads
    q = jnp.transpose(w.reshape(B_, n, nheads, Ch), (0, 2, 1, 3))[None]
    attn = jnp.einsum("zbhnc,zbhmc->zbhnm", q, q)
    return attn, jnp.zeros_like(attn, dtype=jnp.int32)


if __name__ == "__main__":
    B, T, C, H, W = 2, 2, 4, 16, 16
    key = jax.random.PRNGKey(0)
    vid = jax.random.normal(key, (B, T, C, H, W), dtype=jnp.float32)

    search = NLSearch(k=7, ps=7, nheads=1)
    attn, inds = search(vid)
    jax.block_until_ready(attn)
    jax.block_until_ready(inds)

    attn_ref, inds_ref = _reference(vid, nheads=1)
    assert attn.shape == attn_ref.shape and inds.shape == inds_ref.shape
    assert inds.dtype == jnp.int32
    assert jnp.allclose(attn, attn_ref, atol=1e-4, rtol=1e-4)
    assert int(jnp.sum(jnp.abs(inds))) == 0

    print("KERNEL_OK")
</pallas_src>

<mosaic_0001>
module attributes {stable_mosaic.version = 11 : i64} {
  func.func @_window_attn_kernel(%arg0: i32, %arg1: memref<8x64x4xf32, #tpu.memory_space<vmem>>, %arg2: memref<8x4096xf32, #tpu.memory_space<vmem>>) attributes {dimension_semantics = [#tpu.dimension_semantics<parallel>], iteration_bounds = array<i64: 2>, scalar_prefetch = 0 : i64, scratch_operands = 0 : i64, tpu.core_type = #tpu.core_type<tc>, window_params = [{transform_indices = @transform_0, window_bounds = array<i64: 8, 64, 4>}, {transform_indices = @transform_1, window_bounds = array<i64: 8, 4096>}]} {
    %c0_i32 = arith.constant 0 : i32
    %c8_i32 = arith.constant 8 : i32
    %0 = arith.muli %c0_i32, %c8_i32 : i32
    %1 = tpu.assume_multiple %0, 8 : i32
    %2 = arith.index_cast %1 : i32 to index
    %c0 = arith.constant 0 : index
    %c0_0 = arith.constant 0 : index
    %3 = vector.load %arg1[%2, %c0, %c0_0] : memref<8x64x4xf32, #tpu.memory_space<vmem>>, vector<8x64x4xf32>
    "tpu.trace_start"() <{level = 10 : i32, message = "bnc,bmc->bnm"}> : () -> ()
    %cst = arith.constant dense<0.000000e+00> : vector<8x64x64xf32>
    %4 = tpu.matmul %3, %3, %cst {dimension_numbers = #tpu.dot_dimension_numbers<[2], [2], [1], [1], [0, 0, 0, 1, 1, 1], [0], [0]>} : vector<8x64x4xf32>, vector<8x64x4xf32>, vector<8x64x64xf32> -> vector<8x64x64xf32>
    "tpu.trace_stop"() : () -> ()
    %5 = vector.shape_cast %4 : vector<8x64x64xf32> to vector<8x4096xf32>
    %6 = arith.index_cast %1 : i32 to index
    %c0_1 = arith.constant 0 : index
    %7 = vector.load %arg2[%6, %c0_1] : memref<8x4096xf32, #tpu.memory_space<vmem>>, vector<8x4096xf32>
    tpu.vector_store %arg2[%6, %c0_1], %5 {strides = array<i32>} : memref<8x4096xf32, #tpu.memory_space<vmem>>, vector<8x4096xf32>,
    %c1_i32 = arith.constant 1 : i32
    return
  }
  func.func @transform_0(%arg0: i32) -> (i32, i32, i32) {
    %c0_i32 = arith.constant 0 : i32
    %c0_i32_0 = arith.constant 0 : i32
    %c0_i32_1 = arith.constant 0 : i32
    return %arg0, %c0_i32, %c0_i32_0 : i32, i32, i32
  }
  func.func @transform_1(%arg0: i32) -> (i32, i32) {
    %c0_i32 = arith.constant 0 : i32
    %c0_i32_0 = arith.constant 0 : i32
    return %arg0, %c0_i32 : i32, i32
  }
}

</mosaic_0001>

<bundles_post_ra>
// kernel: tpu_custom_call.1
= control target key start
LH: loop header
LB: loop body
LE: loop exit
PB: predicated region body
PF: predicated region fallthrough
CT: control target
= control target key end

     0   :  { %6 = vsyncpa [#allocation3], 0  ;;  %s4896_s0 = inlined_call_operand.vmem [shape: f32[16,64,4], index: 0, kind: input, shape index: {}]   ;;  %s4897_s1 = inlined_call_operand.hbm [shape: f32[16,4096], index: 1, kind: output, shape index: {}]  }
   0x1   :  { %8 = vsyncpa [#allocation3 + $0x1], 0  ;;  %s3384_s6 = smov 0   ;;  %s3386_s7 = smov 0  }
   0x2   :  { %s3388_s8 = smov 0   ;;  %s3390_s9 = smov 0  }
   0x3 LB: > { %s3405_s10 = sadd.s32 4294967295, %s3368_s9   ;;  %s2577_s11 = sadd.s32 4294967294, %s3368_s9   ;;  %s3368_s9 = sphi %s3390_s9, %s5113_s9   ;;  %s3364_s8 = sphi %s3388_s8, %s5112_s8   ;;  %s3360_s7 = sphi %s3386_s7, %s5111_s7   ;;  %s3356_s6 = sphi %s3384_s6, %s5110_s6  }
   0x4   : > { %s3409_s12 = sadd.s32 1, %s3368_s9   ;;  %s47_s13 = sadd.s32 1, %s3364_s8 }
   0x5   : > { %s44_s14 = ssub.s32 %s3368_s9, %s3409_s12  ;;  %p57_p0 = scmp.ne.s32.totalorder %s3364_s8, %s3360_s7 }
   0x6   : > { %p45_p1 = scmp.eq.s32.totalorder %s44_s14, 0  ;;  %p58_p2 = scmp.eq.s32.totalorder %s3405_s10, 1 }
   0x7   : > { %p63_p3 = scmp.ne.s32.totalorder %s3360_s7, %s3356_s6  ;;  %p64_p4 = scmp.eq.s32.totalorder %s2577_s11, 1 }
   0x8   : > { %s3420_s15 = scalar_select %p45_p1, %s3364_s8, %s47_s13  }
   0x9   : > { %p3422_p5 = por %p58_p2, %p57_p0  ;;  %p3426_p6 = por %p64_p4, %p63_p3 }
   0xa   : > { %p2580_p7 = scmp.ge.s32.totalorder %s3368_s9, 1  ;;  %p92_p8 = scmp.lt.s32.totalorder %s3368_s9, 3 }
   0xc   : > { %p93_p9 = pnand %p2580_p7, %p92_p8 }
   0xe   : > { %96 = sbr.rel (%p93_p9) target bundleno = 581 (0x245), region = 24 }
  0x15   : > { %s2582_s18 = sshll.u32 %s3405_s10, 3  ;;  %vm186_vm0 = vcmask 31744   ;;  %s3372_s23 = smov 64   ;;  %vm2435_vm2 = vcmask 523264  }
  0x16   : > { %p114_p10 = scmp.lt.s32.totalorder %s2582_s18, 15  ;;  %vm3440_vm1 = vmpackc.low %vm186_vm0, %vm186_vm0  ;;  %s110_s24 = sand.u32 1, %s3360_s7  }
  0x17   : > { %s2581_s25 = sshll.u32 %s110_s24, 8  ;;  %s2719_s27 = sshll.u32 %s3405_s10, 12 }
  0x18   : > { %s5115_s18 = smov (!%p114_p10, %s2582_s18), 15  ;;  %s4693_s26 = scalar_lea.vmem [#allocation2], %s2581_s25 }
  0x19   : > { %s2718_s19 = sshll.u32 %s5115_s18, 6  ;;  %s2518_s28 = sshll.u32 %s4693_s26, 4  ;;  %s4849_s28 = int_to_ptr.vmem [resolvable:$true] %s2518_s28 }
  0x1a   : > { %s3436_s22 = scalar_lea.vmem %s4896_s0, %s2718_s19  ;;  %s4847_s2 = scalar_lea.hbm %s4897_s1, %s2719_s27 }
  0x1b   : > { %v122_v1 = vld [vmem:[%s3436_s22] sm:$0xff]  ;;  %v123_v2 = vld [vmem:[%s3436_s22 + $0x8] sm:$0xff]  ;;  %v124_v6 = vld [vmem:[%s3436_s22 + $0x10] sm:$0xff]  ;;  %s2504_s3 = scalar_lea.sflag [#allocation3], %s110_s24  ;;  %s3306_s4 = scalar_lea.vmem %s4849_s28, 4096 }
  0x1c   : > { %v130_v3 = vld [vmem:[%s3436_s22 + $0x40] sm:$0xff]  ;;  %v3072_v4 = vpack.c.bf16 %v123_v2, %v122_v1  ;;  %v131_v5 = vld [vmem:[%s3436_s22 + $0x48] sm:$0xff]  ;;  %v125_v7 = vld [vmem:[%s3436_s22 + $0x18] sm:$0xff]  ;;  %2864 = vmatprep.mubr.msk.f32.mxu0 %vm186_vm0, %v122_v1  ;;  %p3307_p11 = scmp.ne.s32.totalorder %s4849_s28, %s3306_s4  ;;  %s3373_s5 = smov [#allocation2]  }
  0x1d   : > { %2892 = vmatprep.mubr.msk.f32.mxu1 %vm186_vm0, %v130_v3  ;;  %v3096_v8 = vpack.c.bf16 %v131_v5, %v130_v3  ;;  %v3078_v9 = vpack.c.bf16 %v125_v7, %v124_v6  ;;  %v132_v10 = vld [vmem:[%s3436_s22 + $0x50] sm:$0xff]  ;;  %v133_v11 = vld [vmem:[%s3436_s22 + $0x58] sm:$0xff]  ;;  %v126_v13 = vld [vmem:[%s3436_s22 + $0x20] sm:$0xff]  ;;  %s3310_s10 = sshll.u32 %s3373_s5, 4  ;;  %s3311_s10 = int_to_ptr.vmem [resolvable:$false] %s3310_s10 }
  0x1e   : > { %3074 = vmatprep.subr.msk.bf16.mxu0 %vm3440_vm1, %v3072_v4  ;;  %v3102_v12 = vpack.c.bf16 %v133_v11, %v132_v10  ;;  %v127_v14 = vld [vmem:[%s3436_s22 + $0x28] sm:$0xff]  ;;  %v134_v15 = vld [vmem:[%s3436_s22 + $0x60] sm:$0xff]  ;;  %v128_v19 = vld [vmem:[%s3436_s22 + $0x30] sm:$0xff]  ;;  %p3308_p12 = pnand %p3307_p11, %p3422_p5  ;;  %s3312_s11 = scalar_lea.vmem %s3311_s10, 8192 }
  0x1f   : > { %3098 = vmatprep.subr.msk.bf16.mxu1 %vm3440_vm1, %v3096_v8  ;;  %3077 = vmatpush3.bf16.xpose.msk.msra.mxu0 %vm3440_vm1, %v3072_v4  ;;  %v135_v16 = vld [vmem:[%s3436_s22 + $0x68] sm:$0xff]  ;;  %v3084_v17 = vpack.c.bf16 %v127_v14, %v126_v13  ;;  %v129_v20 = vld [vmem:[%s3436_s22 + $0x38] sm:$0xff]  ;;  %v136_v21 = vld [vmem:[%s3436_s22 + $0x70] sm:$0xff]  ;;  %p3313_p0 = scmp.lt.s32.totalorder %s4849_s28, %s3311_s10  ;;  %p3314_p1 = scmp.lt.s32.totalorder %s3312_s11, %s3306_s4 }
  0x20   : > { %3101 = vmatpush3.bf16.xpose.msk.msra.mxu1 %vm3440_vm1, %v3096_v8  ;;  %3080 = vmatprep.subr.msk.bf16.mxu0 %vm3440_vm1, %v3078_v9  ;;  %v3108_v18 = vpack.c.bf16 %v135_v16, %v134_v15  ;;  %v137_v22 = vld [vmem:[%s3436_s22 + $0x78] sm:$0xff]  ;;  %v3090_v23 = vpack.c.bf16 %v129_v20, %v128_v19  ;;  %v138_v25 = vld [vmem:[%s3436_s22 + $0x80] sm:$0xff]  ;;  %v3492_v26 = vld [vmem:[%s3436_s22 + $0x88] sm:$0xff]  ;;  %p3309_p13 = pneg %p3308_p12 }
  0x21   : > { %3104 = vmatprep.subr.msk.bf16.mxu1 %vm3440_vm1, %v3102_v12  ;;  %v3114_v24 = vpack.c.bf16 %v137_v22, %v136_v21  ;;  %v146_v27 = vld [vmem:[%s3436_s22 + $0xc0] sm:$0xff]  ;;  %v3496_v28 = vld [vmem:[%s3436_s22 + $0xc8] sm:$0xff]  ;;  %v3120_v29 = vpack.c.bf16 %v3492_v26, %v138_v25  ;;  %v3509_v31 = vld [vmem:[%s3436_s22 + $0x90] sm:$0xff]  ;;  %p3315_p2 = por %p3314_p1, %p3313_p0 }
  0x22   : > { %v3144_v30 = vpack.c.bf16 %v3496_v28, %v146_v27  ;;  %v3512_v32 = vld [vmem:[%s3436_s22 + $0x98] sm:$0xff]  ;;  %v3515_v33 = vld [vmem:[%s3436_s22 + $0xd0] sm:$0xff]  ;;  %v142_v37 = vld [vmem:[%s3436_s22 + $0xa0] sm:$0xff] }
  0x23   : > { %v3518_v34 = vld [vmem:[%s3436_s22 + $0xd8] sm:$0xff]  ;;  %v3126_v35 = vpack.c.bf16 %v3512_v32, %v3509_v31  ;;  %v3536_v38 = vld [vmem:[%s3436_s22 + $0xa8] sm:$0xff]  ;;  %v150_v39 = vld [vmem:[%s3436_s22 + $0xe0] sm:$0xff]  ;;  %p3316_p3 = pnand %p3315_p2, %p3309_p13 }
  0x24   : > { %v3150_v36 = vpack.c.bf16 %v3518_v34, %v3515_v33  ;;  %v3541_v40 = vld [vmem:[%s3436_s22 + $0xe8] sm:$0xff]  ;;  %v3132_v41 = vpack.c.bf16 %v3536_v38, %v142_v37  ;;  %v144_v43 = vld [vmem:[%s3436_s22 + $0xb0] sm:$0xff]  ;;  %v145_v44 = vld [vmem:[%s3436_s22 + $0xb8] sm:$0xff] }
  0x25   : > { %v3156_v42 = vpack.c.bf16 %v3541_v40, %v150_v39  ;;  %v152_v45 = vld [vmem:[%s3436_s22 + $0xf0] sm:$0xff]  ;;  %v153_v46 = vld [vmem:[%s3436_s22 + $0xf8] sm:$0xff]  ;;  %v3138_v47 = vpack.c.bf16 %v145_v44, %v144_v43  ;;  %v154_v49 = vld [vmem:[%s3436_s22 + $0x100] sm:$0xff] }
  0x26   : > { %v3162_v48 = vpack.c.bf16 %v153_v46, %v152_v45  ;;  %v3580_v50 = vld [vmem:[%s3436_s22 + $0x108] sm:$0xff]  ;;  %v162_v51 = vld [vmem:[%s3436_s22 + $0x140] sm:$0xff]  ;;  %v3597_v55 = vld [vmem:[%s3436_s22 + $0x110] sm:$0xff] }
  0x27   : > { %3083 = vmatpush3.bf16.xpose.msk.msra.mxu0 %vm3440_vm1, %v3078_v9  ;;  %v3584_v52 = vld [vmem:[%s3436_s22 + $0x148] sm:$0xff]  ;;  %v3168_v53 = vpack.c.bf16 %v3580_v50, %v154_v49  ;;  %v3600_v56 = vld [vmem:[%s3436_s22 + $0x118] sm:$0xff]  ;;  %v3603_v57 = vld [vmem:[%s3436_s22 + $0x150] sm:$0xff] }
  0x28   : > { %3107 = vmatpush3.bf16.xpose.msk.msra.mxu1 %vm3440_vm1, %v3102_v12  ;;  %3086 = vmatprep.subr.msk.bf16.mxu0 %vm3440_vm1, %v3084_v17  ;;  %v3192_v54 = vpack.c.bf16 %v3584_v52, %v162_v51  ;;  %v3606_v58 = vld [vmem:[%s3436_s22 + $0x158] sm:$0xff]  ;;  %v3174_v59 = vpack.c.bf16 %v3600_v56, %v3597_v55  ;;  %v158_v61 = vld [vmem:[%s3436_s22 + $0x120] sm:$0xff]  ;;  %v3632_v62 = vld [vmem:[%s3436_s22 + $0x128] sm:$0xff] }
  0x29   : > { %3110 = vmatprep.subr.msk.bf16.mxu1 %vm3440_vm1, %v3108_v18  ;;  %v3198_v60 = vpack.c.bf16 %v3606_v58, %v3603_v57  ;;  %v166_v63 = vld [vmem:[%s3436_s22 + $0x160] sm:$0xff]  ;;  %v167_v1 = vld [vmem:[%s3436_s22 + $0x168] sm:$0xff]  ;;  %v160_v4 = vld [vmem:[%s3436_s22 + $0x130] sm:$0xff] }
  0x2a   : > { %v3204_v3 = vpack.c.bf16 %v167_v1, %v166_v63  ;;  %v178_v12 = vld [vmem:[%s3436_s22 + $0x1c0] sm:$0xff] }
  0x2f   : > { %3089 = vmatpush3.bf16.xpose.msk.msra.mxu0 %vm3440_vm1, %v3084_v17  ;;  %v173_v17 = vld [vmem:[%s3436_s22 + $0x198] sm:$0xff] }
  0x30   : > { %3113 = vmatpush3.bf16.xpose.msk.msra.mxu1 %vm3440_vm1, %v3108_v18  ;;  %3092 = vmatprep.subr.msk.bf16.mxu0 %vm3440_vm1, %v3090_v23  ;;  %v180_v18 = vld [vmem:[%s3436_s22 + $0x1d0] sm:$0xff] }
  0x31   : > { %3116 = vmatprep.subr.msk.bf16.mxu1 %vm3440_vm1, %v3114_v24 }
  0x37   : > { %3095 = vmatpush3.bf16.xpose.msk.msra.mxu0 %vm3440_vm1, %v3090_v23  ;;  %v175_v23 = vld [vmem:[%s3436_s22 + $0x1a8] sm:$0xff] }
  0x38   : > { %3119 = vmatpush3.bf16.xpose.msk.msra.mxu1 %vm3440_vm1, %v3114_v24  ;;  %3122 = vmatprep.subr.msk.bf16.mxu0 %vm3440_vm1, %v3120_v29  ;;  %v182_v24 = vld [vmem:[%s3436_s22 + $0x1e0] sm:$0xff] }
  0x39   : > { %3146 = vmatprep.subr.msk.bf16.mxu1 %vm3440_vm1, %v3144_v30 }
  0x3e   : > { %2865 = vmatmul.mubr.msk.f32.vlgmr.msra.gmra.mrb[0].mxu0 %vm186_vm0, %v123_v2  ;;  %v3180_v2 = vpack.c.bf16 %v3632_v62, %v158_v61 }
  0x3f   : > { %2893 = vmatmul.mubr.msk.f32.vlgmr.msra.gmra.mrb[0].mxu1 %vm186_vm0, %v131_v5  ;;  %3125 = vmatpush3.bf16.xpose.msk.msra.mxu0 %vm3440_vm1, %v3120_v29  ;;  %v161_v5 = vld [vmem:[%s3436_s22 + $0x138] sm:$0xff] }
  0x40   : > { %3149 = vmatpush3.bf16.xpose.msk.msra.mxu1 %vm3440_vm1, %v3144_v30  ;;  %3128 = vmatprep.subr.msk.bf16.mxu0 %vm3440_vm1, %v3126_v35  ;;  %v3186_v8 = vpack.c.bf16 %v161_v5, %v160_v4  ;;  %v177_v29 = vld [vmem:[%s3436_s22 + $0x1b8] sm:$0xff]  ;;  %v184_v30 = vld [vmem:[%s3436_s22 + $0x1f0] sm:$0xff] }
  0x41   : > { %3152 = vmatprep.subr.msk.bf16.mxu1 %vm3440_vm1, %v3150_v36  ;;  %2867 = vmatprep.mubr.msk.f32.mxu0 %vm186_vm0, %v124_v6  ;;  %v168_v6 = vld [vmem:[%s3436_s22 + $0x170] sm:$0xff] }
  0x42   : > { %2895 = vmatprep.mubr.msk.f32.mxu1 %vm186_vm0, %v132_v10  ;;  %2868 = vmatmul.mubr.msk.f32.gmra.mrb[2].mxu0 %vm186_vm0, %v125_v7  ;;  %v169_v7 = vld [vmem:[%s3436_s22 + $0x178] sm:$0xff]  ;;  %v170_v10 = vld [vmem:[%s3436_s22 + $0x180] sm:$0xff] }
  0x43   : > { %2896 = vmatmul.mubr.msk.f32.gmra.mrb[2].mxu1 %vm186_vm0, %v133_v11  ;;  %2870 = vmatprep.mubr.msk.f32.mxu0 %vm186_vm0, %v126_v13  ;;  %v3210_v9 = vpack.c.bf16 %v169_v7, %v168_v6  ;;  %v171_v11 = vld [vmem:[%s3436_s22 + $0x188] sm:$0xff] }
  0x44   : > { %2898 = vmatprep.mubr.msk.f32.mxu1 %vm186_vm0, %v134_v15  ;;  %v179_v13 = vld [vmem:[%s3436_s22 + $0x1c8] sm:$0xff] }
  0x45   : > { %v3240_v15 = vpack.c.bf16 %v179_v13, %v178_v12 }
  0x46   : > { %2871 = vmatmul.mubr.msk.f32.gmra.mrb[4].mxu0 %vm186_vm0, %v127_v14  ;;  %v3216_v14 = vpack.c.bf16 %v171_v11, %v170_v10 }
  0x47   : > { %3131 = vmatpush3.bf16.xpose.msk.msra.mxu0 %vm3440_vm1, %v3126_v35  ;;  %2899 = vmatmul.mubr.msk.f32.gmra.mrb[4].mxu1 %vm186_vm0, %v135_v16  ;;  %v172_v16 = vld [vmem:[%s3436_s22 + $0x190] sm:$0xff] }
  0x48   : > { %3155 = vmatpush3.bf16.xpose.msk.msra.mxu1 %vm3440_vm1, %v3150_v36  ;;  %3134 = vmatprep.subr.msk.bf16.mxu0 %vm3440_vm1, %v3132_v41 }
  0x49   : > { %3158 = vmatprep.subr.msk.bf16.mxu1 %vm3440_vm1, %v3156_v42  ;;  %2873 = vmatprep.mubr.msk.f32.mxu0 %vm186_vm0, %v128_v19  ;;  %v181_v19 = vld [vmem:[%s3436_s22 + $0x1d8] sm:$0xff] }
  0x4a   : > { %2901 = vmatprep.mubr.msk.f32.mxu1 %vm186_vm0, %v136_v21  ;;  %2874 = vmatmul.mubr.msk.f32.gmra.mrb[6].mxu0 %vm186_vm0, %v129_v20  ;;  %v3222_v20 = vpack.c.bf16 %v173_v17, %v172_v16  ;;  %v3246_v21 = vpack.c.bf16 %v181_v19, %v180_v18 }
  0x4b   : > { %2902 = vmatmul.mubr.msk.f32.gmra.mrb[6].mxu1 %vm186_vm0, %v137_v22  ;;  %2920 = vmatprep.mubr.msk.f32.mxu0 %vm186_vm0, %v138_v25  ;;  %v174_v22 = vld [vmem:[%s3436_s22 + $0x1a0] sm:$0xff]  ;;  %v183_v25 = vld [vmem:[%s3436_s22 + $0x1e8] sm:$0xff] }
  0x4c   : > { %2948 = vmatprep.mubr.msk.f32.mxu1 %vm186_vm0, %v146_v27  ;;  %v3252_v27 = vpack.c.bf16 %v183_v25, %v182_v24 }
  0x4f   : > { %3137 = vmatpush3.bf16.xpose.msk.msra.mxu0 %vm3440_vm1, %v3132_v41 }
  0x50   : > { %3161 = vmatpush3.bf16.xpose.msk.msra.mxu1 %vm3440_vm1, %v3156_v42  ;;  %3140 = vmatprep.subr.msk.bf16.mxu0 %vm3440_vm1, %v3138_v47 }
  0x51   : > { %3164 = vmatprep.subr.msk.bf16.mxu1 %vm3440_vm1, %v3162_v48 }
  0x57   : > { %3143 = vmatpush3.bf16.xpose.msk.msra.mxu0 %vm3440_vm1, %v3138_v47 }
  0x58   : > { %3167 = vmatpush3.bf16.xpose.msk.msra.mxu1 %vm3440_vm1, %v3162_v48  ;;  %3170 = vmatprep.subr.msk.bf16.mxu0 %vm3440_vm1, %v3168_v53 }
  0x59   : > { %3194 = vmatprep.subr.msk.bf16.mxu1 %vm3440_vm1, %v3192_v54 }
  0x5e   : > { %2921 = vmatmul.mubr.msk.f32.vlgmr.msra.gmra.mrb[8].mxu0 %vm186_vm0, %v3492_v26  ;;  %v3228_v26 = vpack.c.bf16 %v175_v23, %v174_v22 }
  0x5f   : > { %2949 = vmatmul.mubr.msk.f32.vlgmr.msra.gmra.mrb[8].mxu1 %vm186_vm0, %v3496_v28  ;;  %3173 = vmatpush3.bf16.xpose.msk.msra.mxu0 %vm3440_vm1, %v3168_v53  ;;  %v176_v28 = vld [vmem:[%s3436_s22 + $0x1b0] sm:$0xff] }
  0x60   : > { %3197 = vmatpush3.bf16.xpose.msk.msra.mxu1 %vm3440_vm1, %v3192_v54  ;;  %2923 = vmatprep.mubr.msk.f32.mxu0 %vm186_vm0, %v3509_v31  ;;  %v185_v31 = vld [vmem:[%s3436_s22 + $0x1f8] sm:$0xff] }
  0x61   : > { %2951 = vmatprep.mubr.msk.f32.mxu1 %vm186_vm0, %v3515_v33  ;;  %3176 = vmatprep.subr.msk.bf16.mxu0 %vm3440_vm1, %v3174_v59  ;;  %v3258_v33 = vpack.c.bf16 %v185_v31, %v184_v30 }
  0x62   : > { %2924 = vmatmul.mubr.msk.f32.gmra.mrb[10].mxu0 %vm186_vm0, %v3512_v32  ;;  %3200 = vmatprep.subr.msk.bf16.mxu1 %vm3440_vm1, %v3198_v60  ;;  %v3234_v32 = vpack.c.bf16 %v177_v29, %v176_v28 }
  0x63   : > { %2952 = vmatmul.mubr.msk.f32.gmra.mrb[10].mxu1 %vm186_vm0, %v3518_v34  ;;  %2926 = vmatprep.mubr.msk.f32.mxu0 %vm186_vm0, %v142_v37 }
  0x64   : > { %2954 = vmatprep.mubr.msk.f32.mxu1 %vm186_vm0, %v150_v39 }
  0x66   : > { %2927 = vmatmul.mubr.msk.f32.gmra.mrb[12].mxu0 %vm186_vm0, %v3536_v38 }
  0x67   : > { %2955 = vmatmul.mubr.msk.f32.gmra.mrb[12].mxu1 %vm186_vm0, %v3541_v40  ;;  %3179 = vmatpush3.bf16.xpose.msk.msra.mxu0 %vm3440_vm1, %v3174_v59 }
  0x68   : > { %3203 = vmatpush3.bf16.xpose.msk.msra.mxu1 %vm3440_vm1, %v3198_v60  ;;  %2929 = vmatprep.mubr.msk.f32.mxu0 %vm186_vm0, %v144_v43  ;;  %v3371_v60 = vmov 1934713408  }
  0x69   : > { %2957 = vmatprep.mubr.msk.f32.mxu1 %vm186_vm0, %v152_v45  ;;  %3182 = vmatprep.subr.msk.bf16.mxu0 %vm3440_vm1, %v3180_v2 }
  0x6a   : > { %2930 = vmatmul.mubr.msk.f32.gmra.mrb[14].mxu0 %vm186_vm0, %v145_v44  ;;  %3206 = vmatprep.subr.msk.bf16.mxu1 %vm3440_vm1, %v3204_v3 }
  0x6b   : > { %2958 = vmatmul.mubr.msk.f32.gmra.mrb[14].mxu1 %vm186_vm0, %v153_v46  ;;  %2976 = vmatprep.mubr.msk.f32.mxu0 %vm186_vm0, %v154_v49  ;;  %v3370_v49 = vmov 1983009808  }
  0x6c   : > { %3004 = vmatprep.mubr.msk.f32.mxu1 %vm186_vm0, %v162_v51  ;;  %v1224_v51 = vlaneseq }
  0x6e   : > { %v3780_v53 = vshrl.u32 %v1224_v51, 7 }
  0x6f   : > { %3185 = vmatpush3.bf16.xpose.msk.msra.mxu0 %vm3440_vm1, %v3180_v2 }
  0x70   : > { %3209 = vmatpush3.bf16.xpose.msk.msra.mxu1 %vm3440_vm1, %v3204_v3  ;;  %3188 = vmatprep.subr.msk.bf16.mxu0 %vm3440_vm1, %v3186_v8 }
  0x71   : > { %3212 = vmatprep.subr.msk.bf16.mxu1 %vm3440_vm1, %v3210_v9 }
  0x77   : > { %3191 = vmatpush3.bf16.xpose.msk.msra.mxu0 %vm3440_vm1, %v3186_v8 }
  0x78   : > { %3215 = vmatpush3.bf16.xpose.msk.msra.mxu1 %vm3440_vm1, %v3210_v9  ;;  %3218 = vmatprep.subr.msk.bf16.mxu0 %vm3440_vm1, %v3216_v14 }
  0x79   : > { %3242 = vmatprep.subr.msk.bf16.mxu1 %vm3440_vm1, %v3240_v15 }
  0x7e   : > { %2977 = vmatmul.mubr.msk.f32.vlgmr.msra.gmra.mrb[16].mxu0 %vm186_vm0, %v3580_v50  ;;  %v1222_v50 = vunpack.c.l.s4 %v3370_v49 }
  0x7f   : > { %3005 = vmatmul.mubr.msk.f32.vlgmr.msra.gmra.mrb[16].mxu1 %vm186_vm0, %v3584_v52  ;;  %3221 = vmatpush3.bf16.xpose.msk.msra.mxu0 %vm3440_vm1, %v3216_v14 }
  0x80   : > { %3245 = vmatpush3.bf16.xpose.msk.msra.mxu1 %vm3440_vm1, %v3240_v15  ;;  %3224 = vmatprep.subr.msk.bf16.mxu0 %vm3440_vm1, %v3222_v20  ;;  %v1223_v52 = vunpack.c.0.s8 %v1222_v50 }
  0x81   : > { %3248 = vmatprep.subr.msk.bf16.mxu1 %vm3440_vm1, %v3246_v21  ;;  %2979 = vmatprep.mubr.msk.f32.mxu0 %vm186_vm0, %v3597_v55 }
  0x82   : > { %3007 = vmatprep.mubr.msk.f32.mxu1 %vm186_vm0, %v3603_v57  ;;  %2980 = vmatmul.mubr.msk.f32.gmra.mrb[18].mxu0 %vm186_vm0, %v3600_v56  ;;  %v3783_v54 = vsub.s32 %v1223_v52, %v3780_v53 }
  0x83   : > { %3008 = vmatmul.mubr.msk.f32.gmra.mrb[18].mxu1 %vm186_vm0, %v3606_v58  ;;  %2982 = vmatprep.mubr.msk.f32.mxu0 %vm186_vm0, %v158_v61  ;;  %v3785_v61 = vunpack.c.l.s4 %v3371_v60 }
  0x84   : > { %3010 = vmatprep.mubr.msk.f32.mxu1 %vm186_vm0, %v166_v63 }
  0x86   : > { %2983 = vmatmul.mubr.msk.f32.gmra.mrb[20].mxu0 %vm186_vm0, %v3632_v62 }
  0x87   : > { %3227 = vmatpush3.bf16.xpose.msk.msra.mxu0 %vm3440_vm1, %v3222_v20  ;;  %3011 = vmatmul.mubr.msk.f32.gmra.mrb[20].mxu1 %vm186_vm0, %v167_v1 }
  0x88   : > { %3251 = vmatpush3.bf16.xpose.msk.msra.mxu1 %vm3440_vm1, %v3246_v21  ;;  %3230 = vmatprep.subr.msk.bf16.mxu0 %vm3440_vm1, %v3228_v26 }
  0x89   : > { %3254 = vmatprep.subr.msk.bf16.mxu1 %vm3440_vm1, %v3252_v27  ;;  %2985 = vmatprep.mubr.msk.f32.mxu0 %vm186_vm0, %v160_v4 }
  0x8a   : > { %3013 = vmatprep.mubr.msk.f32.mxu1 %vm186_vm0, %v168_v6  ;;  %2986 = vmatmul.mubr.msk.f32.gmra.mrb[22].mxu0 %vm186_vm0, %v161_v5 }
  0x8b   : > { %3014 = vmatmul.mubr.msk.f32.gmra.mrb[22].mxu1 %vm186_vm0, %v169_v7  ;;  %3032 = vmatprep.mubr.msk.f32.mxu0 %vm186_vm0, %v170_v10 }
  0x8c   : > { %3060 = vmatprep.mubr.msk.f32.mxu1 %vm186_vm0, %v178_v12 }
  0x8f   : > { %3233 = vmatpush3.bf16.xpose.msk.msra.mxu0 %vm3440_vm1, %v3228_v26 }
  0x90   : > { %3257 = vmatpush3.bf16.xpose.msk.msra.mxu1 %vm3440_vm1, %v3252_v27  ;;  %3236 = vmatprep.subr.msk.bf16.mxu0 %vm3440_vm1, %v3234_v32 }
  0x91   : > { %3260 = vmatprep.subr.msk.bf16.mxu1 %vm3440_vm1, %v3258_v33 }
  0x97   : > { %3239 = vmatpush3.bf16.xpose.msk.msra.mxu0 %vm3440_vm1, %v3234_v32 }
  0x98   : > { %3263 = vmatpush3.bf16.xpose.msk.msra.mxu1 %vm3440_vm1, %v3258_v33 }
  0x9e   : > { %3033 = vmatmul.mubr.msk.f32.vlgmr.msra.gmra.mrb[24].mxu0 %vm186_vm0, %v171_v11 }
  0x9f   : > { %3061 = vmatmul.mubr.msk.f32.vlgmr.msra.gmra.mrb[24].mxu1 %vm186_vm0, %v179_v13  ;;  %3035 = vmatprep.mubr.msk.f32.mxu0 %vm186_vm0, %v172_v16 }
  0xa0   : > { %3063 = vmatprep.mubr.msk.f32.mxu1 %vm186_vm0, %v180_v18 }
  0xa2   : > { %3036 = vmatmul.mubr.msk.f32.gmra.mrb[26].mxu0 %vm186_vm0, %v173_v17 }
  0xa3   : > { %3064 = vmatmul.mubr.msk.f32.gmra.mrb[26].mxu1 %vm186_vm0, %v181_v19  ;;  %3038 = vmatprep.mubr.msk.f32.mxu0 %vm186_vm0, %v174_v22 }
  0xa4   : > { %3066 = vmatprep.mubr.msk.f32.mxu1 %vm186_vm0, %v182_v24 }
  0xa6   : > { %3039 = vmatmul.mubr.msk.f32.gmra.mrb[28].mxu0 %vm186_vm0, %v175_v23 }
  0xa7   : > { %3067 = vmatmul.mubr.msk.f32.gmra.mrb[28].mxu1 %vm186_vm0, %v183_v25  ;;  %3041 = vmatprep.mubr.msk.f32.mxu0 %vm186_vm0, %v176_v28 }
  0xa8   : > { %3069 = vmatprep.mubr.msk.f32.mxu1 %vm186_vm0, %v184_v30 }
  0xaa   : > { %3042 = vmatmul.mubr.msk.f32.gmra.mrb[30].mxu0 %vm186_vm0, %v177_v29 }
  0xab   : > { %3070 = vmatmul.mubr.msk.f32.gmra.mrb[30].mxu1 %vm186_vm0, %v185_v31 }
 0x111   : > { %v2866_v0 = vpop.f32.mrb[0].mxu0 }
 0x112   : > { %v2894_v34 = vpop.f32.mrb[0].mxu1  ;;  %v277_v35 = vpop.f32.mrb[1].mxu0 }
 0x113   : > { %v406_v36 = vpop.f32.mrb[1].mxu1 }
 0x115   : > { %v2869_v37 = vpop.f32.mrb[2].mxu0 }
 0x116   : > { %v2897_v38 = vpop.f32.mrb[2].mxu1  ;;  %v3760_v39 = vpop.f32.mrb[3].mxu0 }
 0x117   : > { %v3762_v40 = vpop.f32.mrb[3].mxu1 }
 0x119   : > { %v3764_v41 = vpop.f32.mrb[4].mxu0 }
 0x11a   : > { %v3766_v42 = vpop.f32.mrb[4].mxu1  ;;  %v3768_v43 = vpop.f32.mrb[5].mxu0 }
 0x11b   : > { %v3770_v44 = vpop.f32.mrb[5].mxu1 }
 0x11d   : > { %v3772_v45 = vpop.f32.mrb[6].mxu0 }
 0x11e   : > { %v3774_v46 = vpop.f32.mrb[6].mxu1  ;;  %v3776_v47 = vpop.f32.mrb[7].mxu0 }
 0x11f   : > { %v3778_v48 = vpop.f32.mrb[7].mxu1 }
 0x131   : > { %v2922_v55 = vpop.f32.mrb[8].mxu0 }
 0x132   : > { %v1355_v56 = vcombine.low %v2866_v0, %v2922_v55  ;;  %v1356_v57 = vcombine.high %v2866_v0, %v2922_v55  ;;  %v2950_v58 = vpop.f32.mrb[8].mxu1  ;;  %v535_v59 = vpop.f32.mrb[9].mxu0 }
 0x133   : > { %v1371_v62 = vcombine.low %v2894_v34, %v2950_v58  ;;  %v1372_v63 = vcombine.high %v2894_v34, %v2950_v58  ;;  %v1219_v1 = vcombine.low %v277_v35, %v535_v59  ;;  %v1220_v2 = vcombine.high %v277_v35, %v535_v59  ;;  %v664_v3 = vpop.f32.mrb[9].mxu1 }
 0x134   : > { %v3788_v4 = vrot.slane %v1355_v56, %v3783_v54  ;;  %v3791_v5 = vrot.slane %v1356_v57, %v3783_v54  ;;  %v1235_v6 = vcombine.low %v406_v36, %v664_v3  ;;  %v1236_v7 = vcombine.high %v406_v36, %v664_v3 }
 0x135   : > { %v3794_v8 = vrot.slane %v1371_v62, %v3783_v54  ;;  %v3797_v9 = vrot.slane %v1372_v63, %v3783_v54  ;;  %v3800_v10 = vrot.slane %v1219_v1, %v3783_v54  ;;  %v3803_v11 = vrot.slane %v1220_v2, %v3783_v54  ;;  %v2925_v12 = vpop.f32.mrb[10].mxu0 }
 0x136   : > { %v3806_v13 = vrot.slane %v1235_v6, %v3783_v54  ;;  %v3809_v14 = vrot.slane %v1236_v7, %v3783_v54  ;;  %v1627_v15 = vcombine.low %v2869_v37, %v2925_v12  ;;  %v1628_v16 = vcombine.high %v2869_v37, %v2925_v12  ;;  %v2953_v17 = vpop.f32.mrb[10].mxu1  ;;  %v545_v18 = vpop.f32.mrb[11].mxu0 }
 0x137   : > { %v1435_v19 = vcombine.low %v3791_v5, %v3797_v9  ;;  %v1436_v20 = vcombine.high %v3791_v5, %v3797_v9  ;;  %v1643_v21 = vcombine.low %v2897_v38, %v2953_v17  ;;  %v1644_v22 = vcombine.high %v2897_v38, %v2953_v17  ;;  %v674_v23 = vpop.f32.mrb[11].mxu1 }
 0x138   : > { %v1283_v24 = vcombine.low %v3800_v10, %v3806_v13  ;;  %v1284_v25 = vcombine.high %v3800_v10, %v3806_v13  ;;  %v1299_v26 = vcombine.low %v3803_v11, %v3809_v14  ;;  %v1300_v27 = vcombine.high %v3803_v11, %v3809_v14 }
 0x139   : > { %v3824_v28 = vrot.slane %v1627_v15, %v3783_v54  ;;  %v3827_v29 = vrot.slane %v1628_v16, %v3783_v54  ;;  %v3830_v30 = vrot.slane %v1643_v21, %v3783_v54  ;;  %v3833_v31 = vrot.slane %v1644_v22, %v3783_v54  ;;  %v2928_v32 = vpop.f32.mrb[12].mxu0 }
 0x13a   : > { %v1491_v33 = vcombine.low %v3760_v39, %v545_v18  ;;  %v1492_v0 = vcombine.high %v3760_v39, %v545_v18  ;;  %v1507_v34 = vcombine.low %v3762_v40, %v674_v23  ;;  %v1508_v35 = vcombine.high %v3762_v40, %v674_v23  ;;  %v2956_v36 = vpop.f32.mrb[12].mxu1  ;;  %v555_v37 = vpop.f32.mrb[13].mxu0 }
 0x13b   : > { %v1691_v38 = vcombine.low %v3824_v28, %v3830_v30  ;;  %v1692_v49 = vcombine.high %v3824_v28, %v3830_v30  ;;  %v684_v52 = vpop.f32.mrb[13].mxu1  ;;  %v1899_v57 = vcombine.low %v3764_v41, %v2928_v32  ;;  %v1900_v58 = vcombine.high %v3764_v41, %v2928_v32 }
 0x13c   : > { %v3848_v39 = vrot.slane %v1491_v33, %v3783_v54  ;;  %v3851_v40 = vrot.slane %v1492_v0, %v3783_v54  ;;  %v3854_v55 = vrot.slane %v1507_v34, %v3783_v54  ;;  %v3857_v56 = vrot.slane %v1508_v35, %v3783_v54 }
 0x13d   : > { %v1915_v59 = vcombine.low %v3766_v42, %v2956_v36  ;;  %v1916_v60 = vcombine.high %v3766_v42, %v2956_v36  ;;  %v2931_v62 = vpop.f32.mrb[14].mxu0  ;;  %v3872_v41 = vrot.slane %v1899_v57, %v3783_v54  ;;  %v3875_v42 = vrot.slane %v1900_v58, %v3783_v54 }
 0x13e   : > { %v2959_v6 = vpop.f32.mrb[14].mxu1  ;;  %v565_v7 = vpop.f32.mrb[15].mxu0  ;;  %v1763_v17 = vcombine.low %v3768_v43, %v555_v37  ;;  %v1764_v18 = vcombine.high %v3768_v43, %v555_v37  ;;  %v1779_v21 = vcombine.low %v3770_v44, %v684_v52  ;;  %v1780_v22 = vcombine.high %v3770_v44, %v684_v52 }
 0x13f   : > { %v3878_v12 = vrot.slane %v1915_v59, %v3783_v54  ;;  %v3881_v15 = vrot.slane %v1916_v60, %v3783_v54  ;;  %v694_v16 = vpop.f32.mrb[15].mxu1  ;;  %v2171_v36 = vcombine.low %v3772_v45, %v2931_v62  ;;  %v2172_v37 = vcombine.high %v3772_v45, %v2931_v62 }
 0x140   : > { %v3896_v34 = vrot.slane %v1763_v17, %v3783_v54  ;;  %v3899_v43 = vrot.slane %v1764_v18, %v3783_v54  ;;  %v3902_v44 = vrot.slane %v1779_v21, %v3783_v54  ;;  %v3905_v35 = vrot.slane %v1780_v22, %v3783_v54 }
 0x141   : > { %v2187_v52 = vcombine.low %v3774_v46, %v2959_v6  ;;  %v2188_v57 = vcombine.high %v3774_v46, %v2959_v6  ;;  %v3920_v18 = vrot.slane %v2171_v36, %v3783_v54  ;;  %v3923_v45 = vrot.slane %v2172_v37, %v3783_v54 }
 0x142   : > { %v2035_v6 = vcombine.low %v3776_v47, %v565_v7  ;;  %v2036_v21 = vcombine.high %v3776_v47, %v565_v7  ;;  %v2051_v22 = vcombine.low %v3778_v48, %v694_v16  ;;  %v2052_v60 = vcombine.high %v3778_v48, %v694_v16 }
 0x143   : > { %v3926_v46 = vrot.slane %v2187_v52, %v3783_v54  ;;  %v3929_v62 = vrot.slane %v2188_v57, %v3783_v54  ;;  %v1420_v16 = vcombine.high %v3788_v4, %v3794_v8  ;;  %v4955_v11 = vcombine.high %v3827_v29, %v3833_v31 }
 0x144   : > { %v2043_v17 = vrot.slane %v2035_v6, %v3783_v54  ;;  %v3945_v47 = vrot.slane %v2036_v21, %v3783_v54  ;;  %v2059_v7 = vrot.slane %v2051_v22, %v3783_v54  ;;  %v2066_v48 = vrot.slane %v2052_v60, %v3783_v54 }
 0x145   : > { %v2235_v36 = vcombine.low %v3920_v18, %v3926_v46  ;;  %v2236_v37 = vcombine.high %v3920_v18, %v3926_v46  ;;  %v2251_v52 = vcombine.low %v3923_v45, %v3929_v62  ;;  %v1419_v18 = vcombine.low %v3788_v4, %v3794_v8 }
 0x146   : > { %v2099_v46 = vcombine.low %v2043_v17, %v2059_v7  ;;  %v2100_v58 = vcombine.high %v2043_v17, %v2059_v7  ;;  %v2115_v59 = vcombine.low %v3945_v47, %v2066_v48  ;;  %v2116_v57 = vcombine.high %v3945_v47, %v2066_v48 }
 0x147   : > { %v1287_v6 = vunpack.c.0.s8 %v3785_v61  ;;  %v4957_v10 = vcombine.low %v3827_v29, %v3833_v31  ;;  %v4961_v28 = vcombine.high %v3851_v40, %v3857_v56  ;;  %v4962_v29 = vcombine.low %v3851_v40, %v3857_v56 }
 0x148   : > { %v4968_v40 = vcombine.low %v3875_v42, %v3881_v15 }
 0x149   : > { %v3957_v21 = vsub.s32 %v1287_v6, %v3780_v53 }
 0x14b   : > { %v3964_v0 = vrot.slane %v2251_v52, %v3957_v21  ;;  %v3996_v3 = vrot.slane %v1436_v20, %v3957_v21  ;;  %v3999_v63 = vrot.slane %v1420_v16, %v3957_v21  ;;  %v4002_v1 = vrot.slane %v1419_v18, %v3957_v21 }
 0x14c   : > { %v4008_v50 = vrot.slane %v1435_v19, %v3957_v21  ;;  %v4014_v51 = vrot.slane %v1299_v26, %v3957_v21  ;;  %v4020_v20 = vrot.slane %v1283_v24, %v3957_v21  ;;  %v4026_v16 = vrot.slane %v1300_v27, %v3957_v21 }
 0x14d   : > { %4949 = vst [vmem:[#allocation5_spill] sm:$0xff] %v3964_v0  ;;  %4950 = vst [vmem:[#allocation6_spill] sm:$0xff] %v3999_v63  ;;  %v4032_v5 = vrot.slane %v1284_v25, %v3957_v21  ;;  %v4038_v9 = vrot.slane %v1692_v49, %v3957_v21  ;;  %v4044_v19 = vrot.slane %v1691_v38, %v3957_v21 }
 0x14e   : > { %4951 = vst [vmem:[#allocation7_spill] sm:$0xff] %v4002_v1  ;;  %v4050_v14 = vrot.slane %v4955_v11, %v3957_v21  ;;  %v4056_v13 = vrot.slane %v4957_v10, %v3957_v21  ;;  %v4959_v24 = vcombine.high %v3848_v39, %v3854_v55  ;;  %v4960_v26 = vcombine.low %v3848_v39, %v3854_v55 }
 0x14f   : > { %4952 = vst [vmem:[#allocation8_spill] sm:$0xff] %v4032_v5  ;;  %4953 = vst [vmem:[#allocation9_spill] sm:$0xff] %v4038_v9  ;;  %v4074_v30 = vrot.slane %v4961_v28, %v3957_v21  ;;  %v4080_v31 = vrot.slane %v4962_v29, %v3957_v21  ;;  %v4964_v38 = vcombine.high %v3872_v41, %v3878_v12 }
 0x150   : > { %4954 = vst [vmem:[#allocation10_spill] sm:$0xff] %v4044_v19  ;;  %4956 = vst [vmem:[#allocation11_spill] sm:$0xff] %v4050_v14  ;;  %v4062_v25 = vrot.slane %v4959_v24, %v3957_v21  ;;  %v4068_v27 = vrot.slane %v4960_v26, %v3957_v21  ;;  %v4965_v39 = vcombine.low %v3872_v41, %v3878_v12 }
 0x151   : > { %v2978_v22 = vpop.f32.mrb[16].mxu0  ;;  %4958 = vst [vmem:[#allocation12_spill] sm:$0xff] %v4056_v13  ;;  %4963 = vst [vmem:[#allocation13_spill] sm:$0xff] %v4080_v31  ;;  %v4086_v49 = vrot.slane %v4964_v38, %v3957_v21  ;;  %v4966_v18 = vcombine.high %v3875_v42, %v3881_v15  ;;  %v4104_v56 = vrot.slane %v4968_v40, %v3957_v21 }
 0x152   : > { %v3959_v33 = vpop.f32.mrb[16].mxu1  ;;  %v3961_v60 = vpop.f32.mrb[17].mxu0  ;;  %v4092_v55 = vrot.slane %v4965_v39, %v3957_v21  ;;  %v4969_v10 = vcombine.high %v3896_v34, %v3902_v44  ;;  %v4971_v41 = vcombine.low %v3896_v34, %v3902_v44  ;;  %v4973_v26 = vcombine.high %v3899_v43, %v3905_v35 }
 0x153   : > { %v3966_v4 = vpop.f32.mrb[17].mxu1  ;;  %v4098_v11 = vrot.slane %v4966_v18, %v3957_v21  ;;  %v4975_v42 = vcombine.low %v3899_v43, %v3905_v35  ;;  %v4131_v29 = vrot.slane %v2236_v37, %v3957_v21  ;;  %v4134_v34 = vrot.slane %v2235_v36, %v3957_v21 }
 0x154   : > { %v4110_v24 = vrot.slane %v4969_v10, %v3957_v21  ;;  %v4116_v12 = vrot.slane %v4971_v41, %v3957_v21  ;;  %v4122_v28 = vrot.slane %v4973_v26, %v3957_v21  ;;  %v4137_v44 = vrot.slane %v2100_v58, %v3957_v21 }
 0x155   : > { %v3968_v8 = vpop.f32.mrb[18].mxu0  ;;  %4967 = vst [vmem:[#allocation14_spill] sm:$0xff] %v4098_v11  ;;  %v4128_v15 = vrot.slane %v4975_v42, %v3957_v21  ;;  %4977 = vst [vmem:[#allocation19_spill] sm:$0xff] %v4131_v29  ;;  %v4140_v39 = vrot.slane %v2099_v46, %v3957_v21  ;;  %v4143_v18 = vrot.slane %v2116_v57, %v3957_v21 }
 0x156   : > { %v3970_v17 = vpop.f32.mrb[18].mxu1  ;;  %v3972_v47 = vpop.f32.mrb[19].mxu0  ;;  %4970 = vst [vmem:[#allocation15_spill] sm:$0xff] %v4110_v24  ;;  %4972 = vst [vmem:[#allocation16_spill] sm:$0xff] %v4116_v12  ;;  %v4146_v37 = vrot.slane %v2115_v59, %v3957_v21  ;;  %v4983_v36 = vcombine.high %v3923_v45, %v3929_v62 }
 0x157   : > { %v3974_v61 = vpop.f32.mrb[19].mxu1  ;;  %4974 = vst [vmem:[#allocation17_spill] sm:$0xff] %v4122_v28  ;;  %4976 = vst [vmem:[#allocation18_spill] sm:$0xff] %v4128_v15 }
 0x158   : > { %4978 = vst [vmem:[#allocation20_spill] sm:$0xff] %v4134_v34  ;;  %4979 = vst [vmem:[#allocation21_spill] sm:$0xff] %v4137_v44  ;;  %v4152_v41 = vrot.slane %v4983_v36, %v3957_v21 }
 0x159   : > { %v3976_v53 = vpop.f32.mrb[20].mxu0  ;;  %4980 = vst [vmem:[#allocation22_spill] sm:$0xff] %v4140_v39  ;;  %4981 = vst [vmem:[#allocation23_spill] sm:$0xff] %v4143_v18 }
 0x15a   : > { %v3978_v7 = vpop.f32.mrb[20].mxu1  ;;  %v3980_v48 = vpop.f32.mrb[21].mxu0  ;;  %4982 = vst [vmem:[#allocation24_spill] sm:$0xff] %v4146_v37  ;;  %4984 = vst [vmem:[#allocation25_spill] sm:$0xff] %v4152_v41 }
 0x15b   : > { %v3982_v6 = vpop.f32.mrb[21].mxu1 }
 0x15d   : > { %v3984_v52 = vpop.f32.mrb[22].mxu0 }
 0x15e   : > { %v3986_v23 = vpop.f32.mrb[22].mxu1  ;;  %v3988_v32 = vpop.f32.mrb[23].mxu0 }
 0x15f   : > { %v3990_v2 = vpop.f32.mrb[23].mxu1 }
 0x171   : > { %v3034_v38 = vpop.f32.mrb[24].mxu0 }
 0x172   : > { %v1387_v40 = vcombine.low %v2978_v22, %v3034_v38  ;;  %v1388_v43 = vcombine.high %v2978_v22, %v3034_v38  ;;  %v3062_v35 = vpop.f32.mrb[24].mxu1  ;;  %v1051_v10 = vpop.f32.mrb[25].mxu0 }
 0x173   : > { %v1403_v58 = vcombine.low %v3959_v33, %v3062_v35  ;;  %v1404_v46 = vcombine.high %v3959_v33, %v3062_v35  ;;  %v1251_v57 = vcombine.low %v3961_v60, %v1051_v10  ;;  %v1252_v26 = vcombine.high %v3961_v60, %v1051_v10  ;;  %v1180_v22 = vpop.f32.mrb[25].mxu1 }
 0x174   : > { %v4159_v42 = vrot.slane %v1387_v40, %v3783_v54  ;;  %v4162_v59 = vrot.slane %v1388_v43, %v3783_v54  ;;  %v1267_v38 = vcombine.low %v3966_v4, %v1180_v22  ;;  %v1268_v45 = vcombine.high %v3966_v4, %v1180_v22 }
 0x175   : > { %v4167_v62 = vrot.slane %v1403_v58, %v3783_v54  ;;  %v4170_v33 = vrot.slane %v1404_v46, %v3783_v54  ;;  %v4173_v35 = vrot.slane %v1251_v57, %v3783_v54  ;;  %v4176_v60 = vrot.slane %v1252_v26, %v3783_v54  ;;  %v3037_v40 = vpop.f32.mrb[26].mxu0 }
 0x176   : > { %v4179_v43 = vrot.slane %v1267_v38, %v3783_v54  ;;  %v4182_v10 = vrot.slane %v1268_v45, %v3783_v54  ;;  %v1659_v4 = vcombine.low %v3968_v8, %v3037_v40  ;;  %v1660_v36 = vcombine.high %v3968_v8, %v3037_v40  ;;  %v3065_v58 = vpop.f32.mrb[26].mxu1  ;;  %v1061_v46 = vpop.f32.mrb[27].mxu0 }
 0x177   : > { %v1675_v22 = vcombine.low %v3970_v17, %v3065_v58  ;;  %v1676_v38 = vcombine.high %v3970_v17, %v3065_v58  ;;  %v1190_v0 = vpop.f32.mrb[27].mxu1  ;;  %v1523_v41 = vcombine.low %v3972_v47, %v1061_v46  ;;  %v1524_v8 = vcombine.high %v3972_v47, %v1061_v46 }
 0x178   : > { %v4201_v57 = vrot.slane %v1659_v4, %v3783_v54  ;;  %v4204_v26 = vrot.slane %v1660_v36, %v3783_v54  ;;  %v1539_v37 = vcombine.low %v3974_v61, %v1190_v0  ;;  %v1540_v40 = vcombine.high %v3974_v61, %v1190_v0 }
 0x179   : > { %v4207_v17 = vrot.slane %v1675_v22, %v3783_v54  ;;  %v4210_v58 = vrot.slane %v1676_v38, %v3783_v54  ;;  %v3040_v45 = vpop.f32.mrb[28].mxu0  ;;  %v4225_v47 = vrot.slane %v1523_v41, %v3783_v54  ;;  %v4228_v0 = vrot.slane %v1524_v8, %v3783_v54 }
 0x17a   : > { %v3068_v4 = vpop.f32.mrb[28].mxu1  ;;  %v1071_v18 = vpop.f32.mrb[29].mxu0  ;;  %v4231_v61 = vrot.slane %v1539_v37, %v3783_v54  ;;  %v4234_v46 = vrot.slane %v1540_v40, %v3783_v54  ;;  %v1931_v36 = vcombine.low %v3976_v53, %v3040_v45  ;;  %v1932_v38 = vcombine.high %v3976_v53, %v3040_v45 }
 0x17b   : > { %v1200_v44 = vpop.f32.mrb[29].mxu1  ;;  %v1947_v22 = vcombine.low %v3978_v7, %v3068_v4  ;;  %v1948_v39 = vcombine.high %v3978_v7, %v3068_v4  ;;  %v1795_v37 = vcombine.low %v3980_v48, %v1071_v18  ;;  %v1796_v8 = vcombine.high %v3980_v48, %v1071_v18 }
 0x17c   : > { %v4249_v53 = vrot.slane %v1931_v36, %v3783_v54  ;;  %v4252_v7 = vrot.slane %v1932_v38, %v3783_v54  ;;  %v1811_v40 = vcombine.low %v3982_v6, %v1200_v44  ;;  %v1812_v28 = vcombine.high %v3982_v6, %v1200_v44 }
 0x17d   : > { %v3043_v34 = vpop.f32.mrb[30].mxu0  ;;  %v4255_v45 = vrot.slane %v1947_v22, %v3783_v54  ;;  %v4258_v4 = vrot.slane %v1948_v39, %v3783_v54  ;;  %v4273_v12 = vrot.slane %v1795_v37, %v3783_v54  ;;  %v4276_v48 = vrot.slane %v1796_v8, %v3783_v54 }
 0x17e   : > { %v3071_v29 = vpop.f32.mrb[30].mxu1  ;;  %v1081_v15 = vpop.f32.mrb[31].mxu0  ;;  %v4279_v6 = vrot.slane %v1811_v40, %v3783_v54  ;;  %v4282_v44 = vrot.slane %v1812_v28, %v3783_v54  ;;  %v1452_v18 = vcombine.high %v4159_v42, %v4167_v62  ;;  %v1451_v22 = vcombine.low %v4159_v42, %v4167_v62 }
 0x17f   : > { %v1210_v41 = vpop.f32.mrb[31].mxu1  ;;  %v2203_v39 = vcombine.low %v3984_v52, %v3043_v34  ;;  %v2204_v37 = vcombine.high %v3984_v52, %v3043_v34  ;;  %v2219_v62 = vcombine.low %v3986_v23, %v3071_v29  ;;  %v2220_v8 = vcombine.high %v3986_v23, %v3071_v29 }
 0x180   : > { %v4299_v38 = vrot.slane %v1452_v18, %v3957_v21  ;;  %v4302_v42 = vrot.slane %v1451_v22, %v3957_v21  ;;  %v2067_v28 = vcombine.low %v3988_v32, %v1081_v15  ;;  %v2068_v36 = vcombine.high %v3988_v32, %v1081_v15 }
 0x181   : > { %v4305_v52 = vrot.slane %v2203_v39, %v3783_v54  ;;  %v4308_v34 = vrot.slane %v2204_v37, %v3783_v54  ;;  %v4323_v40 = vrot.slane %v2219_v62, %v3783_v54  ;;  %v4326_v23 = vrot.slane %v2220_v8, %v3783_v54 }
 0x182   : > { %4985 = vst [vmem:[#allocation26_spill] sm:$0xff] %v4299_v38  ;;  %4986 = vst [vmem:[#allocation27_spill] sm:$0xff] %v4302_v42  ;;  %v1486_v18 = vcombine.high %v3999_v63, %v4299_v38  ;;  %v1484_v39 = vcombine.high %v4002_v1, %v4302_v42  ;;  %v4329_v32 = vrot.slane %v2067_v28, %v3783_v54 }
 0x183   : > { %v4332_v15 = vrot.slane %v2068_v36, %v3783_v54  ;;  %v2083_v29 = vcombine.low %v3990_v2, %v1210_v41  ;;  %v2084_v37 = vcombine.high %v3990_v2, %v1210_v41  ;;  %v4987_v8 = vcombine.high %v4162_v59, %v4170_v33 }
 0x184   : > { %2328 = vrot.lane.b32.xlu1 %v1486_v18, %s3372_s23  ;;  %2324 = vrot.lane.b32.xlu0 %v1484_v39, %s3372_s23  ;;  %v2267_v28 = vcombine.low %v4305_v52, %v4323_v40  ;;  %v2268_v36 = vcombine.high %v4305_v52, %v4323_v40  ;;  %v2284_v39 = vcombine.high %v4308_v34, %v4326_v23 }
 0x185   : > { %v4342_v62 = vrot.slane %v4987_v8, %v3957_v21  ;;  %v2091_v2 = vrot.slane %v2083_v29, %v3783_v54  ;;  %v2098_v41 = vrot.slane %v2084_v37, %v3783_v54  ;;  %v4988_v22 = vcombine.low %v4162_v59, %v4170_v33 }
 0x186   : > { %v4989_v40 = vcombine.low %v4176_v60, %v4182_v10  ;;  %v4990_v29 = vcombine.low %v4173_v35, %v4179_v43  ;;  %v4991_v37 = vcombine.high %v4176_v60, %v4182_v10  ;;  %v4992_v59 = vcombine.high %v4173_v35, %v4179_v43 }
 0x187   : > { %v1490_v8 = vcombine.high %v3996_v3, %v4342_v62  ;;  %v4360_v42 = vrot.slane %v4988_v22, %v3957_v21  ;;  %v2131_v22 = vcombine.low %v4329_v32, %v2091_v2  ;;  %v2147_v1 = vcombine.low %v4332_v15, %v2098_v41 }
 0x188   : > { %v4366_v52 = vrot.slane %v4989_v40, %v3957_v21  ;;  %v4372_v54 = vrot.slane %v4990_v29, %v3957_v21  ;;  %v4378_v18 = vrot.slane %v4991_v37, %v3957_v21  ;;  %v4384_v33 = vrot.slane %v4992_v59, %v3957_v21 }
 0x189   : > { %v2132_v40 = vcombine.high %v4329_v32, %v2091_v2  ;;  %v2148_v29 = vcombine.high %v4332_v15, %v2098_v41  ;;  %2336 = vrot.lane.b32.xlu1 %v1490_v8, %s3372_s23  ;;  %v1488_v60 = vcombine.high %v4008_v50, %v4360_v42  ;;  %v4994_v15 = vcombine.high %v4201_v57, %v4207_v17 }
 0x18a   : > { %4993 = vst [vmem:[#allocation28_spill] sm:$0xff] %v4384_v33  ;;  %v1352_v10 = vcombine.high %v4014_v51, %v4366_v52  ;;  %v1348_v35 = vcombine.high %v4020_v20, %v4372_v54  ;;  %v1354_v43 = vcombine.high %v4026_v16, %v4378_v18  ;;  %v1350_v32 = vcombine.high %v4032_v5, %v4384_v33  ;;  %v5052_v33 = vld [vmem:[#allocation25_spill] sm:$0xff] }
 0x18b   : > { %v4405_v2 = vrot.slane %v4994_v15, %v3957_v21  ;;  %v4996_v41 = vcombine.low %v4201_v57, %v4207_v17  ;;  %v4998_v37 = vcombine.high %v4204_v26, %v4210_v58  ;;  %2332 = vrot.lane.b32.xlu0 %v1488_v60, %s3372_s23  ;;  %v5000_v38 = vcombine.low %v4204_v26, %v4210_v58 }
 0x18c   : > { %v5002_v57 = vcombine.high %v4225_v47, %v4231_v61  ;;  %v5004_v60 = vcombine.high %v4228_v0, %v4234_v46 }
 0x18d   : > { %4995 = vst [vmem:[#allocation29_spill] sm:$0xff] %v4405_v2  ;;  %v4411_v8 = vrot.slane %v4996_v41, %v3957_v21  ;;  %v4417_v59 = vrot.slane %v4998_v37, %v3957_v21  ;;  %v4424_v15 = vrot.slane %v5000_v38, %v3957_v21  ;;  %v5003_v41 = vcombine.low %v4225_v47, %v4231_v61 }
 0x18e   : > { %v4430_v17 = vrot.slane %v5002_v57, %v3957_v21  ;;  %v4442_v63 = vrot.slane %v5004_v60, %v3957_v21  ;;  %2316 = vrot.lane.b32.xlu1 %v1352_v10, %s3372_s23  ;;  %v1758_v26 = vcombine.high %v4038_v9, %v4405_v2  ;;  %v5005_v47 = vcombine.low %v4228_v0, %v4234_v46  ;;  %v5044_v9 = vld [vmem:[#allocation18_spill] sm:$0xff] }
 0x18f   : > { %4997 = vst [vmem:[#allocation30_spill] sm:$0xff] %v4411_v8  ;;  %4999 = vst [vmem:[#allocation31_spill] sm:$0xff] %v4417_v59  ;;  %v4436_v37 = vrot.slane %v5003_v41, %v3957_v21  ;;  %v1756_v58 = vcombine.high %v4044_v19, %v4411_v8  ;;  %v1762_v38 = vcombine.high %v4050_v14, %v4417_v59  ;;  %2308 = vrot.lane.b32.xlu0 %v1348_v35, %s3372_s23  ;;  %v5042_v8 = vld [vmem:[#allocation17_spill] sm:$0xff] }
 0x190   : > { %5001 = vst [vmem:[#allocation32_spill] sm:$0xff] %v4424_v15  ;;  %v4455_v61 = vrot.slane %v5005_v47, %v3957_v21  ;;  %v1760_v57 = vcombine.high %v4056_v13, %v4424_v15  ;;  %v5006_v0 = vcombine.high %v4249_v53, %v4255_v45  ;;  %v5007_v47 = vcombine.low %v4249_v53, %v4255_v45  ;;  %v5040_v13 = vld [vmem:[#allocation16_spill] sm:$0xff] }
 0x191   : > { %v5008_v41 = vcombine.high %v4252_v7, %v4258_v4  ;;  %v5010_v14 = vcombine.low %v4252_v7, %v4258_v4  ;;  %v5012_v53 = vcombine.high %v4273_v12, %v4279_v6  ;;  %v5016_v35 = vcombine.high %v4276_v48, %v4282_v44  ;;  %v5021_v7 = vld [vmem:[#allocation17_spill] sm:$0xff]  ;;  %v5022_v4 = vld [vmem:[#allocation18_spill] sm:$0xff] }
 0x192   : > { %v4471_v46 = vrot.slane %v5006_v0, %v3957_v21  ;;  %v4477_v10 = vrot.slane %v5007_v47, %v3957_v21  ;;  %v5014_v47 = vcombine.low %v4273_v12, %v4279_v6  ;;  %2320 = vrot.lane.b32.xlu1 %v1354_v43, %s3372_s23  ;;  %v5018_v12 = vcombine.low %v4276_v48, %v4282_v44 }
 0x193   : > { %v4483_v60 = vrot.slane %v5008_v41, %v3957_v21  ;;  %v4490_v0 = vrot.slane %v5010_v14, %v3957_v21  ;;  %v4496_v45 = vrot.slane %v5012_v53, %v3957_v21  ;;  %v4508_v31 = vrot.slane %v5016_v35, %v3957_v21  ;;  %2312 = vrot.lane.b32.xlu0 %v1350_v32, %s3372_s23 }
 0x194   : > { %v4502_v41 = vrot.slane %v5014_v47, %v3957_v21  ;;  %v4521_v6 = vrot.slane %v5018_v12, %v3957_v21  ;;  %v5020_v47 = vld [vmem:[#allocation16_spill] sm:$0xff]  ;;  %v4537_v48 = vrot.slane %v2267_v28, %v3957_v21  ;;  %v4540_v44 = vrot.slane %v2132_v40, %v3957_v21  ;;  %v5026_v28 = vld [vmem:[#allocation19_spill] sm:$0xff] }
 0x195   : > { %5009 = vst [vmem:[#allocation33_spill] sm:$0xff] %v4483_v60  ;;  %5011 = vst [vmem:[#allocation34_spill] sm:$0xff] %v4490_v0  ;;  %v2032_v53 = vcombine.high %v4104_v56, %v4490_v0  ;;  %v1894_v43 = vcombine.high %v4110_v24, %v4496_v45  ;;  %v1898_v14 = vcombine.high %v5021_v7, %v4508_v31  ;;  %v5051_v0 = vld [vmem:[#allocation21_spill] sm:$0xff] }
 0x196   : > { %5013 = vst [vmem:[#allocation35_spill] sm:$0xff] %v4496_v45  ;;  %5015 = vst [vmem:[#allocation36_spill] sm:$0xff] %v4502_v41  ;;  %v1892_v35 = vcombine.high %v5020_v47, %v4502_v41  ;;  %v1896_v11 = vcombine.high %v5022_v4, %v4521_v6  ;;  %v4534_v60 = vrot.slane %v2268_v36, %v3957_v21  ;;  %2360 = vrot.lane.b32.xlu1 %v1758_v26, %s3372_s23  ;;  %v5027_v4 = vld [vmem:[#allocation20_spill] sm:$0xff]  ;;  %v5031_v26 = vld [vmem:[#allocation23_spill] sm:$0xff] }
 0x197   : > { %5017 = vst [vmem:[#allocation37_spill] sm:$0xff] %v4508_v31  ;;  %5019 = vst [vmem:[#allocation38_spill] sm:$0xff] %v4521_v6  ;;  %v4544_v12 = vrot.slane %v2131_v22, %v3957_v21  ;;  %v4547_v47 = vrot.slane %v2148_v29, %v3957_v21  ;;  %v4550_v7 = vrot.slane %v2147_v1, %v3957_v21  ;;  %v5028_v22 = vld [vmem:[#allocation21_spill] sm:$0xff]  ;;  %2356 = vrot.lane.b32.xlu0 %v1756_v58, %s3372_s23  ;;  %v5049_v45 = vld [vmem:[#allocation20_spill] sm:$0xff] }
 0x198   : > { %5023 = vst [vmem:[#allocation39_spill] sm:$0xff] %v4534_v60  ;;  %5024 = vst [vmem:[#allocation40_spill] sm:$0xff] %v4537_v48  ;;  %v4553_v36 = vrot.slane %v2284_v39, %v3957_v21  ;;  %v2302_v40 = vcombine.high %v5026_v28, %v4534_v60  ;;  %v2300_v32 = vcombine.high %v5027_v4, %v4537_v48  ;;  %v5030_v39 = vld [vmem:[#allocation22_spill] sm:$0xff]  ;;  %v5032_v28 = vld [vmem:[#allocation24_spill] sm:$0xff] }
 0x199   : > { %5025 = vst [vmem:[#allocation41_spill] sm:$0xff] %v4540_v44  ;;  %v2166_v6 = vcombine.high %v5028_v22, %v4540_v44  ;;  %v5029_v29 = vcombine.low %v4308_v34, %v4326_v23  ;;  %v2164_v31 = vcombine.high %v5030_v39, %v4544_v12  ;;  %v2170_v41 = vcombine.high %v5031_v26, %v4547_v47  ;;  %v5033_v4 = vld [vmem:[#allocation25_spill] sm:$0xff] }
 0x19a   : > { %v2168_v60 = vcombine.high %v5032_v28, %v4550_v7  ;;  %v2306_v48 = vcombine.high %v5033_v4, %v4553_v36  ;;  %v5034_v22 = vld [vmem:[#allocation5_spill] sm:$0xff]  ;;  %2368 = vrot.lane.b32.xlu1 %v1762_v38, %s3372_s23  ;;  %v5047_v4 = vcombine.high %v4062_v25, %v4430_v17  ;;  %v2169_v58 = vcombine.low %v5031_v26, %v4547_v47 }
 0x19b   : > { %v4566_v1 = vrot.slane %v5029_v29, %v3957_v21  ;;  %v5036_v38 = vld [vmem:[#allocation13_spill] sm:$0xff]  ;;  %v5038_v29 = vld [vmem:[#allocation14_spill] sm:$0xff]  ;;  %2364 = vrot.lane.b32.xlu0 %v1760_v57, %s3372_s23  ;;  %v5054_v57 = vcombine.high %v4068_v27, %v4436_v37  ;;  %v5055_v21 = vcombine.high %v4074_v30, %v4442_v63  ;;  %v5057_v5 = vcombine.high %v4086_v49, %v4471_v46 }
 0x19c   : > { %v5037_v59 = vld [vmem:[#allocation33_spill] sm:$0xff]  ;;  %v5056_v15 = vcombine.high %v5036_v38, %v4455_v61  ;;  %v5058_v19 = vcombine.high %v4092_v55, %v4477_v10 }
 0x19d   : > { %v2304_v44 = vcombine.high %v5034_v22, %v4566_v1  ;;  %v5039_v34 = vld [vmem:[#allocation36_spill] sm:$0xff] }
 0x19e   : > { %v5041_v23 = vld [vmem:[#allocation37_spill] sm:$0xff]  ;;  %2344 = vrot.lane.b32.xlu1 %v5047_v4, %s3372_s23 }
 0x19f   : > { %v5048_v22 = vld [vmem:[#allocation40_spill] sm:$0xff]  ;;  %v5053_v4 = vld [vmem:[#allocation5_spill] sm:$0xff]  ;;  %2340 = vrot.lane.b32.xlu0 %v5054_v57, %s3372_s23 }
 0x1a0   : > { %v5050_v24 = vld [vmem:[#allocation41_spill] sm:$0xff] }
 0x1a1   : > { %v2165_v2 = vcombine.low %v5051_v0, %v5050_v24 }
 0x1a2   : > { %2352 = vrot.lane.b32.xlu1 %v5055_v21, %s3372_s23  ;;  %v5059_v21 = vcombine.high %v5038_v29, %v5037_v59 }
 0x1a3   : > { %2348 = vrot.lane.b32.xlu0 %v5056_v15, %s3372_s23  ;;  %v5061_v15 = vld [vmem:[#allocation26_spill] sm:$0xff] }
 0x1a6   : > { %2392 = vrot.lane.b32.xlu1 %v5057_v5, %s3372_s23 }
 0x1a7   : > { %2388 = vrot.lane.b32.xlu0 %v5058_v19, %s3372_s23 }
 0x1aa   : > { %2400 = vrot.lane.b32.xlu1 %v5059_v21, %s3372_s23  ;;  %v5068_v21 = vcombine.low %v4014_v51, %v4366_v52  ;;  %v5071_v52 = vld [vmem:[#allocation8_spill] sm:$0xff] }
 0x1ab   : > { %2396 = vrot.lane.b32.xlu0 %v2032_v53, %s3372_s23  ;;  %v5064_v53 = vld [vmem:[#allocation27_spill] sm:$0xff] }
 0x1ae   : > { %2376 = vrot.lane.b32.xlu1 %v1894_v43, %s3372_s23 }
 0x1af   : > { %2372 = vrot.lane.b32.xlu0 %v1892_v35, %s3372_s23  ;;  %v5066_v35 = vcombine.low %v3996_v3, %v4342_v62  ;;  %v5069_v62 = vcombine.low %v4020_v20, %v4372_v54  ;;  %v5074_v54 = vld [vmem:[#allocation9_spill] sm:$0xff] }
 0x1b2   : > { %2384 = vrot.lane.b32.xlu1 %v1898_v14, %s3372_s23 }
 0x1b3   : > { %2380 = vrot.lane.b32.xlu0 %v1896_v11, %s3372_s23  ;;  %v5060_v11 = vld [vmem:[#allocation6_spill] sm:$0xff] }
 0x1b4   : > { %v5062_v14 = vcombine.low %v5060_v11, %v5061_v15  ;;  %v5072_v15 = vld [vmem:[#allocation28_spill] sm:$0xff] }
 0x1b6   : > { %2424 = vrot.lane.b32.xlu1 %v2302_v40, %s3372_s23  ;;  %v5067_v40 = vcombine.low %v4008_v50, %v4360_v42  ;;  %v5070_v42 = vcombine.low %v4026_v16, %v4378_v18  ;;  %v5077_v18 = vld [vmem:[#allocation10_spill] sm:$0xff] }
 0x1b7   : > { %2420 = vrot.lane.b32.xlu0 %v2300_v32, %s3372_s23 }
 0x1ba   : > { %2408 = vrot.lane.b32.xlu1 %v2166_v6, %s3372_s23 }
 0x1bb   : > { %2404 = vrot.lane.b32.xlu0 %v2164_v31, %s3372_s23  ;;  %v5063_v31 = vld [vmem:[#allocation7_spill] sm:$0xff] }
 0x1be   : > { %2416 = vrot.lane.b32.xlu1 %v2170_v41, %s3372_s23  ;;  %v5065_v41 = vcombine.low %v5063_v31, %v5064_v53  ;;  %v5075_v31 = vld [vmem:[#allocation29_spill] sm:$0xff] }
 0x1bf   : > { %2412 = vrot.lane.b32.xlu0 %v2168_v60, %s3372_s23  ;;  %v5076_v53 = vcombine.low %v5074_v54, %v5075_v31 }
 0x1c2   : > { %2432 = vrot.lane.b32.xlu1 %v2306_v48, %s3372_s23 }
 0x1c3   : > { %2428 = vrot.lane.b32.xlu0 %v2304_v44, %s3372_s23 }
 0x1f6   : > { %v2329_v5 = vpop.permute.xlu1 %2328  ;;  %v2325_v19 = vpop.permute.xlu0 %2324 }
 0x1f7   : > { %v2441_v6 = vsel %vm2435_vm2, %v5062_v14, %v2329_v5  ;;  %v2440_v60 = vsel %vm2435_vm2, %v5065_v41, %v2325_v19  ;;  %v5073_v14 = vcombine.low %v5071_v52, %v5072_v15  ;;  %v5087_v52 = vcombine.low %v4068_v27, %v4436_v37 }
 0x1f8   : > { %2476 = vst [vmem:[%s4693_s26 + $0x28] sm:$0xff] %v2441_v6  ;;  %2475 = vst [vmem:[%s4693_s26 + $0x20] sm:$0xff] %v2440_v60  ;;  %v5078_v60 = vld [vmem:[#allocation30_spill] sm:$0xff]  ;;  %v5090_v37 = vcombine.low %v4086_v49, %v4471_v46 }
 0x1f9   : > { %v5093_v46 = vld [vmem:[#allocation34_spill] sm:$0xff] }
 0x1fb   : > { %v2337_v43 = vpop.permute.xlu1 %2336 }
 0x1fc   : > { %v2443_v48 = vsel %vm2435_vm2, %v5066_v35, %v2337_v43  ;;  %v5079_v43 = vcombine.low %v5077_v18, %v5078_v60  ;;  %v5096_v60 = vld [vmem:[#allocation35_spill] sm:$0xff] }
 0x1fd   : > { %2478 = vst [vmem:[%s4693_s26 + $0x38] sm:$0xff] %v2443_v48  ;;  %v2333_v44 = vpop.permute.xlu0 %2332 }
 0x1fe   : > { %v2442_v32 = vsel %vm2435_vm2, %v5067_v40, %v2333_v44  ;;  %v5080_v44 = vld [vmem:[#allocation11_spill] sm:$0xff] }
 0x1ff   : > { %2477 = vst [vmem:[%s4693_s26 + $0x30] sm:$0xff] %v2442_v32  ;;  %v5081_v40 = vld [vmem:[#allocation31_spill] sm:$0xff] }
 0x200   : > { %v2317_v57 = vpop.permute.xlu1 %2316  ;;  %v5082_v32 = vcombine.low %v5080_v44, %v5081_v40  ;;  %v5099_v44 = vcombine.low %v5042_v8, %v5041_v23  ;;  %v5105_v23 = vcombine.low %v5049_v45, %v5048_v22 }
 0x201   : > { %v2438_v5 = vsel %vm2435_vm2, %v5068_v21, %v2317_v57  ;;  %v2309_v3 = vpop.permute.xlu0 %2308 }
 0x202   : > { %2473 = vst [vmem:[%s4693_s26 + $0x10] sm:$0xff] %v2438_v5  ;;  %v2436_v19 = vsel %vm2435_vm2, %v5069_v62, %v2309_v3  ;;  %v5083_v5 = vld [vmem:[#allocation12_spill] sm:$0xff] }
 0x203   : > { %2471 = vst [vmem:[%s4693_s26] sm:$0xff] %v2436_v19  ;;  %v5084_v3 = vld [vmem:[#allocation32_spill] sm:$0xff] }
 0x204   : > { %v2321_v50 = vpop.permute.xlu1 %2320  ;;  %v5085_v62 = vcombine.low %v5083_v5, %v5084_v3  ;;  %v5103_v3 = vld [vmem:[#allocation39_spill] sm:$0xff] }
 0x205   : > { %v2439_v11 = vsel %vm2435_vm2, %v5070_v42, %v2321_v50  ;;  %v2313_v51 = vpop.permute.xlu0 %2312  ;;  %v5086_v42 = vcombine.low %v4062_v25, %v4430_v17  ;;  %v5089_v17 = vcombine.low %v5036_v38, %v4455_v61  ;;  %v5092_v38 = vcombine.low %v5038_v29, %v5037_v59 }
 0x206   : > { %2474 = vst [vmem:[%s4693_s26 + $0x18] sm:$0xff] %v2439_v11  ;;  %v2437_v6 = vsel %vm2435_vm2, %v5073_v14, %v2313_v51  ;;  %v5098_v29 = vcombine.low %v5040_v13, %v5039_v34  ;;  %v5102_v34 = vld [vmem:[#allocation19_spill] sm:$0xff] }
 0x207   : > { %2472 = vst [vmem:[%s4693_s26 + $0x8] sm:$0xff] %v2437_v6  ;;  %v5088_v6 = vcombine.low %v4074_v30, %v4442_v63  ;;  %v5091_v30 = vcombine.low %v4092_v55, %v4477_v10  ;;  %v5095_v10 = vld [vmem:[#allocation15_spill] sm:$0xff] }
 0x208   : > { %v2361_v20 = vpop.permute.xlu1 %2360 }
 0x209   : > { %v2449_v41 = vsel %vm2435_vm2, %v5076_v53, %v2361_v20  ;;  %v2357_v16 = vpop.permute.xlu0 %2356 }
 0x20a   : > { %2484 = vst [vmem:[%s4693_s26 + $0x68] sm:$0xff] %v2449_v41  ;;  %v2448_v35 = vsel %vm2435_vm2, %v5079_v43, %v2357_v16  ;;  %v5094_v16 = vcombine.low %v4104_v56, %v5093_v46  ;;  %v5097_v43 = vcombine.low %v5095_v10, %v5096_v60 }
 0x20b   : > { %2483 = vst [vmem:[%s4693_s26 + $0x60] sm:$0xff] %v2448_v35 }
 0x20c   : > { %v2369_v48 = vpop.permute.xlu1 %2368 }
 0x20d   : > { %v2451_v57 = vsel %vm2435_vm2, %v5082_v32, %v2369_v48  ;;  %v2365_v21 = vpop.permute.xlu0 %2364 }
 0x20e   : > { %2486 = vst [vmem:[%s4693_s26 + $0x78] sm:$0xff] %v2451_v57  ;;  %v2450_v19 = vsel %vm2435_vm2, %v5085_v62, %v2365_v21  ;;  %v5100_v57 = vld [vmem:[#allocation38_spill] sm:$0xff]  ;;  %v5104_v62 = vcombine.low %v5102_v34, %v5103_v3 }
 0x20f   : > { %2485 = vst [vmem:[%s4693_s26 + $0x70] sm:$0xff] %v2450_v19  ;;  %v5101_v21 = vcombine.low %v5044_v9, %v5100_v57 }
 0x210   : > { %v2345_v50 = vpop.permute.xlu1 %2344 }
 0x211   : > { %v2445_v11 = vsel %vm2435_vm2, %v5086_v42, %v2345_v50  ;;  %v2341_v51 = vpop.permute.xlu0 %2340 }
 0x212   : > { %2480 = vst [vmem:[%s4693_s26 + $0x48] sm:$0xff] %v2445_v11  ;;  %v2444_v15 = vsel %vm2435_vm2, %v5087_v52, %v2341_v51  ;;  %v5106_v51 = vcombine.low %v5030_v39, %v4544_v12  ;;  %v5108_v39 = vcombine.low %v5052_v33, %v4553_v36 }
 0x213   : > { %2479 = vst [vmem:[%s4693_s26 + $0x40] sm:$0xff] %v2444_v15 }
 0x214   : > { %v2353_v14 = vpop.permute.xlu1 %2352 }
 0x215   : > { %v2447_v20 = vsel %vm2435_vm2, %v5088_v6, %v2353_v14  ;;  %v2349_v25 = vpop.permute.xlu0 %2348 }
 0x216   : > { %2482 = vst [vmem:[%s4693_s26 + $0x58] sm:$0xff] %v2447_v20  ;;  %v2446_v54 = vsel %vm2435_vm2, %v5089_v17, %v2349_v25 }
 0x217   : > { %2481 = vst [vmem:[%s4693_s26 + $0x50] sm:$0xff] %v2446_v54 }
 0x218   : > { %v2393_v27 = vpop.permute.xlu1 %2392 }
 0x219   : > { %v2457_v31 = vsel %vm2435_vm2, %v5090_v37, %v2393_v27  ;;  %v2389_v63 = vpop.permute.xlu0 %2388 }
 0x21a   : > { %2492 = vst [vmem:[%s4693_s26 + $0xa8] sm:$0xff] %v2457_v31  ;;  %v2456_v53 = vsel %vm2435_vm2, %v5091_v30, %v2389_v63 }
 0x21b   : > { %2491 = vst [vmem:[%s4693_s26 + $0xa0] sm:$0xff] %v2456_v53 }
 0x21c   : > { %v2401_v61 = vpop.permute.xlu1 %2400 }
 0x21d   : > { %v2459_v41 = vsel %vm2435_vm2, %v5092_v38, %v2401_v61  ;;  %v2397_v49 = vpop.permute.xlu0 %2396 }
 0x21e   : > { %2494 = vst [vmem:[%s4693_s26 + $0xb8] sm:$0xff] %v2459_v41  ;;  %v2458_v18 = vsel %vm2435_vm2, %v5094_v16, %v2397_v49 }
 0x21f   : > { %2493 = vst [vmem:[%s4693_s26 + $0xb0] sm:$0xff] %v2458_v18 }
 0x220   : > { %v2377_v55 = vpop.permute.xlu1 %2376 }
 0x221   : > { %v2453_v35 = vsel %vm2435_vm2, %v5097_v43, %v2377_v55  ;;  %v2373_v59 = vpop.permute.xlu0 %2372 }
 0x222   : > { %2488 = vst [vmem:[%s4693_s26 + $0x88] sm:$0xff] %v2453_v35  ;;  %v2452_v48 = vsel %vm2435_vm2, %v5098_v29, %v2373_v59 }
 0x223   : > { %2487 = vst [vmem:[%s4693_s26 + $0x80] sm:$0xff] %v2452_v48 }
 0x224   : > { %v2385_v56 = vpop.permute.xlu1 %2384 }
 0x225   : > { %v2455_v40 = vsel %vm2435_vm2, %v5099_v44, %v2385_v56  ;;  %v2381_v32 = vpop.permute.xlu0 %2380 }
 0x226   : > { %2490 = vst [vmem:[%s4693_s26 + $0x98] sm:$0xff] %v2455_v40  ;;  %v2454_v5 = vsel %vm2435_vm2, %v5101_v21, %v2381_v32 }
 0x227   : > { %2489 = vst [vmem:[%s4693_s26 + $0x90] sm:$0xff] %v2454_v5 }
 0x228   : > { %v2425_v13 = vpop.permute.xlu1 %2424 }
 0x229   : > { %v2465_v19 = vsel %vm2435_vm2, %v5104_v62, %v2425_v13  ;;  %v2421_v8 = vpop.permute.xlu0 %2420 }
 0x22a   : > { %2500 = vst [vmem:[%s4693_s26 + $0xe8] sm:$0xff] %v2465_v19  ;;  %v2464_v50 = vsel %vm2435_vm2, %v5105_v23, %v2421_v8 }
 0x22b   : > { %2499 = vst [vmem:[%s4693_s26 + $0xe0] sm:$0xff] %v2464_v50 }
 0x22c   : > { %v2409_v9 = vpop.permute.xlu1 %2408 }
 0x22d   : > { %v2461_v42 = vsel %vm2435_vm2, %v2165_v2, %v2409_v9  ;;  %v2405_v11 = vpop.permute.xlu0 %2404  ;;  %v5107_v2 = vcombine.low %v5032_v28, %v4550_v7  ;;  %v5109_v7 = vcombine.low %v5053_v4, %v4566_v1 }
 0x22e   : > { %2496 = vst [vmem:[%s4693_s26 + $0xc8] sm:$0xff] %v2461_v42  ;;  %v2460_v52 = vsel %vm2435_vm2, %v5106_v51, %v2405_v11 }
 0x22f   : > { %2495 = vst [vmem:[%s4693_s26 + $0xc0] sm:$0xff] %v2460_v52 }
 0x230   : > { %v2417_v45 = vpop.permute.xlu1 %2416 }
 0x231   : > { %v2463_v22 = vsel %vm2435_vm2, %v2169_v58, %v2417_v45  ;;  %v2413_v24 = vpop.permute.xlu0 %2412 }
 0x232   : > { %2498 = vst [vmem:[%s4693_s26 + $0xd8] sm:$0xff] %v2463_v22  ;;  %v2462_v0 = vsel %vm2435_vm2, %v5107_v2, %v2413_v24 }
 0x233   : > { %2497 = vst [vmem:[%s4693_s26 + $0xd0] sm:$0xff] %v2462_v0 }
 0x234   : > { %v2433_v12 = vpop.permute.xlu1 %2432 }
 0x235   : > { %v2467_v47 = vsel %vm2435_vm2, %v5108_v39, %v2433_v12  ;;  %v2429_v26 = vpop.permute.xlu0 %2428 }
 0x236   : > { %2502 = vst [vmem:[%s4693_s26 + $0xf8] sm:$0xff] %v2467_v47  ;;  %v2466_v28 = vsel %vm2435_vm2, %v5109_v7, %v2429_v26 }
 0x237   : > { %2501 = vst [vmem:[%s4693_s26 + $0xf0] sm:$0xff] %v2466_v28 }
 0x238   : > { %3319 = shalt.err (!%p3316_p3)
}
 0x239   : > { %s3320_s13 = scalar_lea.hbm %s4847_s2, 4096  ;;  %s3324_s19 = scalar_lea.hbm %s4897_s1, 8192 }
 0x23a   : > { %p3321_p4 = scmp.ne.s32.totalorder %s4847_s2, %s3320_s13  ;;  %p3325_p9 = scmp.lt.u32.totalorder %s4847_s2, %s4897_s1 }
 0x23b   : > { %p3326_p10 = scmp.lt.u32.totalorder %s3324_s19, %s3320_s13  ;;  %p3328_p12 = scmp.lt.u32.totalorder %s3320_s13, %s4847_s2 }
 0x23c   : > { %p3322_p7 = pnand %p3321_p4, %p3422_p5 }
 0x23d   : > { %p3327_p11 = por %p3326_p10, %p3325_p9 }
 0x23e   : > { %p3323_p8 = pneg %p3322_p7 }
 0x23f   : > { %p3329_p13 = por %p3328_p12, %p3327_p11 }
 0x241   : > { %p3330_p0 = pnand %p3329_p13, %p3323_p8 }
 0x243   : > { %3333 = shalt.err (!%p3330_p0)
}
 0x244   : > { %3264 = dma.vmem_to_hbm [thread:$0]  (%p3422_p5), %s4849_s28, 4096, %s4847_s2, %s2504_s3  }
 0x245 PF: > { %p3270_p1 = scmp.ge.s32.totalorder %s3368_s9, 2  ;;  %s2530_s22 = sand.u32 1, %s3356_s6  }
 0x246   : > { %s2531_s23 = scalar_lea.sflag [#allocation3], %s2530_s22 }
 0x247   : > { %p3267_p2 = pnand %p3270_p1, %p3426_p6 }
 0x249   : > { %3351 = dma.done.wait (!%p3267_p2), %s2531_s23, 4096  }
 0x24a   : > { %3353 = vsyncadd (!%p3267_p2), %s2531_s23, 4294963200  ;;  %p11_p3 = scmp.ge.s32.totalorder %s3409_s12, 4   ;;  %s5110_s6 = smov %s3360_s7 }
 0x24b   : > { %s5111_s7 = smov %s3364_s8  ;;  %s5112_s8 = smov %s3420_s15 }
 0x24c   : > { %s5113_s9 = smov %s3409_s12  ;;  %13 = sbr.rel (!%p11_p3) target bundleno = 3 (0x3), region = 61 }
 0x253   :  { %2536 = vsyncpa [#allocation3], 1 }
 0x254   :  { %2538 = vsyncpa [#allocation3 + $0x1], 1 }

</bundles_post_ra>
